<compile_context>
chip_gen: v7x
topology: tpu7x:2x2x1
jax: 0.10.0
libtpu: 0.0.40
codegen_flags: <defaults>
</compile_context>

<pallas_src>
import jax
import jax.numpy as jnp
from jax.experimental import pallas as pl
from jax.experimental.pallas import tpu as pltpu

EPS = 1e-5
LANE = 128
VMEM_LIMIT = 32 * 1024 * 1024   # explicit scoped-VMEM budget (safe on v5e/v6e/v7x)


def _round_up(x, m):
    return (x + m - 1) // m * m


# ---------------------------------------------------------------------------
# in-kernel helpers
# ---------------------------------------------------------------------------
def _conv3_taps(x):
    """x: (L, C) f32 -> (L, 3*C) = [x[l-1] | x[l] | x[l+1]] with zero boundaries.

    Uses pltpu.roll (XLU) + iota masking instead of sublane-unaligned slices.
    """
    L = x.shape[0]
    row = jax.lax.broadcasted_iota(jnp.int32, x.shape, 0)
    xm = jnp.where(row == 0, 0.0, pltpu.roll(x, shift=1, axis=0))          # x[l-1]
    xp = jnp.where(row == L - 1, 0.0, pltpu.roll(x, shift=L - 1, axis=0))  # x[l+1]
    return jnp.concatenate([xm, x, xp], axis=-1)


def _conv3(x_f32, w_ref):
    """Fused 3-tap conv: one bf16 MXU contraction with f32 accumulation."""
    taps = _conv3_taps(x_f32).astype(jnp.bfloat16)
    return jnp.dot(taps, w_ref[...], preferred_element_type=jnp.float32)


def _accumulate_stats(stat_ref, y):
    """stat_ref: (2, C) running [sum; sum_sq] over all grid steps (axis 'arbitrary')."""
    s = jnp.sum(y, axis=0, keepdims=True)
    ss = jnp.sum(y * y, axis=0, keepdims=True)

    @pl.when(pl.program_id(0) == 0)
    def _():
        stat_ref[...] = jnp.zeros_like(stat_ref)

    stat_ref[...] += jnp.concatenate([s, ss], axis=0)


# ---------------------------------------------------------------------------
# kernels (grid = (N,), one batch element per step)
# ---------------------------------------------------------------------------
def _conv1_stats_kernel(x_ref, w_ref, y_ref, stat_ref):
    y = _conv3(x_ref[0], w_ref)                 # (L, Cout) f32
    y_ref[0] = y
    _accumulate_stats(stat_ref, y)


def _bn_relu_conv2_stats_kernel(y1_ref, sc_ref, sh_ref, w_ref, y2_ref, stat_ref):
    h = jnp.maximum(y1_ref[0] * sc_ref[...] + sh_ref[...], 0.0)   # BN1+ReLU, f32 FMA
    y = _conv3(h, w_ref)
    y2_ref[0] = y
    _accumulate_stats(stat_ref, y)


def _bn_add_relu_kernel(y2_ref, sc_ref, sh_ref, x_ref, out_ref):
    out_ref[0] = jnp.maximum(
        y2_ref[0] * sc_ref[...] + sh_ref[...] + x_ref[0], 0.0)


# ---------------------------------------------------------------------------
# wrapper
# ---------------------------------------------------------------------------
def _stack_conv_weight(w_oik, cin_p, cout_p):
    """PyTorch (O, I, K=3) -> stacked (3*cin_p, cout_p) bf16, matching tap order."""
    o, i, k = w_oik.shape
    w = jnp.transpose(w_oik, (2, 1, 0)).astype(jnp.float32)       # (K, I, O)
    w = jnp.pad(w, ((0, 0), (0, cin_p - i), (0, cout_p - o)))
    return w.reshape(k * cin_p, cout_p).astype(jnp.bfloat16)


def _fold_bn(stat, gamma_p, beta_p, count):
    """Single-pass stats -> per-channel (scale, shift): BN becomes one FMA."""
    mean = stat[0:1] / count
    var = jnp.maximum(stat[1:2] / count - mean * mean, 0.0)
    scale = gamma_p * jax.lax.rsqrt(var + EPS)
    shift = beta_p - mean * scale
    return scale, shift                                           # (1, C) each


@jax.jit
def resnet18_block(x_ncl, w1_oik, g1, b1, w2_oik, g2, b2):
    """x_ncl: (N, C_in, L) f32, PyTorch layout. Conv weights in PyTorch (O, I, K)."""
    N, Cin, L = x_ncl.shape
    Cout = w1_oik.shape[0]
    Cout2 = w2_oik.shape[0]
    assert Cin == Cout2, "identity residual needs in_channels == out_channels*expansion"

    cip = _round_up(Cin, LANE)
    cop = _round_up(Cout, LANE)
    co2p = _round_up(Cout2, LANE)

    # one-time layout glue: channels-last + lane padding (no length padding --
    # conv boundaries are handled inside the kernels). For chained blocks keep NLC.
    x_nlc = jnp.transpose(x_ncl, (0, 2, 1)).astype(jnp.float32)
    x_p = jnp.pad(x_nlc, ((0, 0), (0, 0), (0, cip - Cin)))         # (N, L, cip)

    w1s = _stack_conv_weight(w1_oik, cip, cop)                     # (3*cip, cop) bf16
    w2s = _stack_conv_weight(w2_oik, cop, co2p)                    # (3*cop, co2p) bf16

    g1p = jnp.pad(g1.astype(jnp.float32), (0, cop - Cout)).reshape(1, cop)
    b1p = jnp.pad(b1.astype(jnp.float32), (0, cop - Cout)).reshape(1, cop)
    g2p = jnp.pad(g2.astype(jnp.float32), (0, co2p - Cout2)).reshape(1, co2p)
    b2p = jnp.pad(b2.astype(jnp.float32), (0, co2p - Cout2)).reshape(1, co2p)

    seq_params = pltpu.CompilerParams(
        dimension_semantics=("arbitrary",), vmem_limit_bytes=VMEM_LIMIT)
    par_params = pltpu.CompilerParams(
        dimension_semantics=("parallel",), vmem_limit_bytes=VMEM_LIMIT)

    # ---- phase 1: conv1 + global (sum, sumsq) for BN1 ----------------------
    y1, stat1 = pl.pallas_call(
        _conv1_stats_kernel,
        grid=(N,),
        in_specs=[pl.BlockSpec((1, L, cip), lambda n: (n, 0, 0)),
                  pl.BlockSpec((3 * cip, cop), lambda n: (0, 0))],
        out_specs=(pl.BlockSpec((1, L, cop), lambda n: (n, 0, 0)),
                   pl.BlockSpec((2, cop), lambda n: (0, 0))),
        out_shape=(jax.ShapeDtypeStruct((N, L, cop), jnp.float32),
                   jax.ShapeDtypeStruct((2, cop), jnp.float32)),
        compiler_params=seq_params,
    )(x_p, w1s)
    scale1, shift1 = _fold_bn(stat1, g1p, b1p, float(N * L))

    # ---- phase 2: BN1 + ReLU + conv2 + global stats for BN2 ----------------
    y2, stat2 = pl.pallas_call(
        _bn_relu_conv2_stats_kernel,
        grid=(N,),
        in_specs=[pl.BlockSpec((1, L, cop), lambda n: (n, 0, 0)),
                  pl.BlockSpec((1, cop), lambda n: (0, 0)),
                  pl.BlockSpec((1, cop), lambda n: (0, 0)),
                  pl.BlockSpec((3 * cop, co2p), lambda n: (0, 0))],
        out_specs=(pl.BlockSpec((1, L, co2p), lambda n: (n, 0, 0)),
                   pl.BlockSpec((2, co2p), lambda n: (0, 0))),
        out_shape=(jax.ShapeDtypeStruct((N, L, co2p), jnp.float32),
                   jax.ShapeDtypeStruct((2, co2p), jnp.float32)),
        compiler_params=seq_params,
    )(y1, scale1, shift1, w2s)
    scale2, shift2 = _fold_bn(stat2, g2p, b2p, float(N * L))

    # ---- phase 3: BN2 + identity residual + ReLU (fully parallel) ----------
    out_p = pl.pallas_call(
        _bn_add_relu_kernel,
        grid=(N,),
        in_specs=[pl.BlockSpec((1, L, co2p), lambda n: (n, 0, 0)),
                  pl.BlockSpec((1, co2p), lambda n: (0, 0)),
                  pl.BlockSpec((1, co2p), lambda n: (0, 0)),
                  pl.BlockSpec((1, L, cip), lambda n: (n, 0, 0))],
        out_specs=pl.BlockSpec((1, L, co2p), lambda n: (n, 0, 0)),
        out_shape=jax.ShapeDtypeStruct((N, L, co2p), jnp.float32),
        compiler_params=par_params,
    )(y2, scale2, shift2, x_p)

    # back to PyTorch NCL layout, dropping channel padding
    return jnp.transpose(out_p[:, :, :Cout2], (0, 2, 1))


# ---------------------------------------------------------------------------
# reference + test
# ---------------------------------------------------------------------------
def _reference(x_ncl, w1, g1, b1, w2, g2, b2, mxu_dtype=jnp.float32):
    """Pure-JAX reference of the PyTorch forward (NCL layout, training-mode BN)."""
    def conv(x, w):
        return jax.lax.conv_general_dilated(
            x.astype(mxu_dtype), w.astype(mxu_dtype),
            window_strides=(1,), padding=((1, 1),),
            dimension_numbers=("NCH", "OIH", "NCH"),
            preferred_element_type=jnp.float32,
            precision=jax.lax.Precision.HIGHEST)

    def bn(y, g, b):
        mean = jnp.mean(y, axis=(0, 2), keepdims=True)
        var = jnp.mean((y - mean) ** 2, axis=(0, 2), keepdims=True)
        return (g[None, :, None] * (y - mean) * jax.lax.rsqrt(var + EPS)
                + b[None, :, None])

    h = jax.nn.relu(bn(conv(x_ncl, w1), g1, b1))
    y = bn(conv(h, w2), g2, b2) + x_ncl
    return jax.nn.relu(y)


if __name__ == "__main__":
    # downsample=None  =>  stride=1 and in_channels == out_channels * expansion
    N, Cin, L = 2, 4, 16
    Cout, expansion = 4, 1

    key = jax.random.PRNGKey(0)
    ks = jax.random.split(key, 7)
    x = jax.random.normal(ks[0], (N, Cin, L), jnp.float32)
    # deterministic synthetic parameters (PyTorch shapes: conv (O, I, K), BN (C,))
    w1 = jax.random.normal(ks[1], (Cout, Cin, 3), jnp.float32) * 0.3
    w2 = jax.random.normal(ks[2], (Cout * expansion, Cout, 3), jnp.float32) * 0.3
    g1 = 1.0 + 0.1 * jax.random.normal(ks[3], (Cout,), jnp.float32)
    b1 = 0.1 * jax.random.normal(ks[4], (Cout,), jnp.float32)
    g2 = 1.0 + 0.1 * jax.random.normal(ks[5], (Cout * expansion,), jnp.float32)
    b2 = 0.1 * jax.random.normal(ks[6], (Cout * expansion,), jnp.float32)

    out = resnet18_block(x, w1, g1, b1, w2, g2, b2)
    out = jax.block_until_ready(out)
    assert out.shape == (N, Cout * expansion, L), out.shape

    # algorithm check vs. a reference using the same bf16 MXU-operand rounding
    ref_bf16 = _reference(x, w1, g1, b1, w2, g2, b2, mxu_dtype=jnp.bfloat16)
    err_bf16 = float(jnp.max(jnp.abs(out - ref_bf16)))
    assert bool(jnp.allclose(out, ref_bf16, atol=1e-2, rtol=1e-2)), err_bf16

    # end-to-end check vs. the full-f32 PyTorch-semantics reference
    ref_f32 = _reference(x, w1, g1, b1, w2, g2, b2, mxu_dtype=jnp.float32)
    err_f32 = float(jnp.max(jnp.abs(out - ref_f32)))
    assert bool(jnp.allclose(out, ref_f32, atol=3e-2, rtol=3e-2)), err_f32

    # TODO(synk): BatchNorm running_mean/running_var buffer updates (training-side
    # state) are not modeled; only the forward output is reproduced.
    print("KERNEL_OK")
</pallas_src>

<mosaic_0001>
module attributes {stable_mosaic.version = 11 : i64} {
  func.func @_bn_relu_conv2_stats_kernel(%arg0: i32, %arg1: memref<1x16x128xf32, #tpu.memory_space<vmem>>, %arg2: memref<1x128xf32, #tpu.memory_space<vmem>>, %arg3: memref<1x128xf32, #tpu.memory_space<vmem>>, %arg4: memref<384x128xbf16, #tpu.memory_space<vmem>>, %arg5: memref<1x16x128xf32, #tpu.memory_space<vmem>>, %arg6: memref<2x128xf32, #tpu.memory_space<vmem>>) attributes {dimension_semantics = [#tpu.dimension_semantics<arbitrary>], iteration_bounds = array<i64: 2>, scalar_prefetch = 0 : i64, scratch_operands = 0 : i64, tpu.core_type = #tpu.core_type<tc>, window_params = [{transform_indices = @transform_0, window_bounds = array<i64: 1, 16, 128>}, {pipeline_mode = #tpu.pipeline_mode<synchronous>, transform_indices = @transform_1, window_bounds = array<i64: 1, 128>}, {pipeline_mode = #tpu.pipeline_mode<synchronous>, transform_indices = @transform_2, window_bounds = array<i64: 1, 128>}, {pipeline_mode = #tpu.pipeline_mode<synchronous>, transform_indices = @transform_3, window_bounds = array<i64: 384, 128>}, {transform_indices = @transform_4, window_bounds = array<i64: 1, 16, 128>}, {pipeline_mode = #tpu.pipeline_mode<synchronous>, transform_indices = @transform_5, window_bounds = array<i64: 2, 128>}]} {
    %c0 = arith.constant 0 : index
    %c0_0 = arith.constant 0 : index
    %c0_1 = arith.constant 0 : index
    %0 = vector.load %arg1[%c0, %c0_0, %c0_1] : memref<1x16x128xf32, #tpu.memory_space<vmem>>, vector<1x16x128xf32>
    %1 = vector.shape_cast %0 : vector<1x16x128xf32> to vector<16x128xf32>
    %c0_2 = arith.constant 0 : index
    %c0_3 = arith.constant 0 : index
    %2 = vector.load %arg2[%c0_2, %c0_3] : memref<1x128xf32, #tpu.memory_space<vmem>>, vector<1x128xf32>
    %3 = vector.broadcast %2 : vector<1x128xf32> to vector<16x128xf32>
    %4 = arith.mulf %1, %3 : vector<16x128xf32>
    %c0_4 = arith.constant 0 : index
    %c0_5 = arith.constant 0 : index
    %5 = vector.load %arg3[%c0_4, %c0_5] : memref<1x128xf32, #tpu.memory_space<vmem>>, vector<1x128xf32>
    %6 = vector.broadcast %5 : vector<1x128xf32> to vector<16x128xf32>
    %7 = arith.addf %4, %6 : vector<16x128xf32>
    %cst = arith.constant 0.000000e+00 : f32
    %8 = vector.broadcast %cst : f32 to vector<16x128xf32>
    %9 = arith.maximumf %7, %8 : vector<16x128xf32>
    %10 = tpu.iota {dimensions = array<i32: 0>} : vector<16x128xi32>
    %c0_i32 = arith.constant 0 : i32
    %11 = vector.broadcast %c0_i32 : i32 to vector<16x128xi32>
    %12 = arith.cmpi eq, %10, %11 : vector<16x128xi32>
    %c1_i32 = arith.constant 1 : i32
    %13 = tpu.dynamic_rotate %9 by %c1_i32 dim 0 : vector<16x128xf32>, i32 -> vector<16x128xf32>
    %cst_6 = arith.constant 0.000000e+00 : f32
    %14 = vector.broadcast %cst_6 : f32 to vector<16x128xf32>
    %15 = arith.select %12, %14, %13 : vector<16x128xi1>, vector<16x128xf32>
    %c15_i32 = arith.constant 15 : i32
    %16 = vector.broadcast %c15_i32 : i32 to vector<16x128xi32>
    %17 = arith.cmpi eq, %10, %16 : vector<16x128xi32>
    %c15_i32_7 = arith.constant 15 : i32
    %18 = tpu.dynamic_rotate %9 by %c15_i32_7 dim 0 : vector<16x128xf32>, i32 -> vector<16x128xf32>
    %cst_8 = arith.constant 0.000000e+00 : f32
    %19 = vector.broadcast %cst_8 : f32 to vector<16x128xf32>
    %20 = arith.select %17, %19, %18 : vector<16x128xi1>, vector<16x128xf32>
    %21 = tpu.concatenate %15, %9, %20 in 1 : vector<16x128xf32>, vector<16x128xf32>, vector<16x128xf32> -> vector<16x384xf32>
    %22 = arith.truncf %21 : vector<16x384xf32> to vector<16x384xbf16>
    %c0_9 = arith.constant 0 : index
    %c0_10 = arith.constant 0 : index
    %23 = vector.load %arg4[%c0_9, %c0_10] : memref<384x128xbf16, #tpu.memory_space<vmem>>, vector<384x128xbf16>
    %cst_11 = arith.constant dense<0.000000e+00> : vector<16x128xf32>
    %24 = tpu.matmul %22, %23, %cst_11 {dimension_numbers = #tpu.dot_dimension_numbers<[1], [0], [0], [1], [0, 0, 1, 1], [], []>} : vector<16x384xbf16>, vector<384x128xbf16>, vector<16x128xf32> -> vector<16x128xf32>
    %c0_12 = arith.constant 0 : index
    %c0_13 = arith.constant 0 : index
    %c0_14 = arith.constant 0 : index
    %25 = vector.load %arg5[%c0_12, %c0_13, %c0_14] : memref<1x16x128xf32, #tpu.memory_space<vmem>>, vector<1x16x128xf32>
    %26 = vector.shape_cast %25 : vector<1x16x128xf32> to vector<16x128xf32>
    %27 = vector.shape_cast %24 : vector<16x128xf32> to vector<1x16x128xf32>
    tpu.vector_store %arg5[%c0_12, %c0_13, %c0_14], %27 {strides = array<i32>} : memref<1x16x128xf32, #tpu.memory_space<vmem>>, vector<1x16x128xf32>,
    %cst_15 = arith.constant dense<0.000000e+00> : vector<128xf32>
    %28 = vector.multi_reduction <add>, %24, %cst_15 [0] : vector<16x128xf32> to vector<128xf32>
    %29 = vector.shape_cast %28 : vector<128xf32> to vector<1x128xf32>
    %30 = arith.mulf %24, %24 : vector<16x128xf32>
    %cst_16 = arith.constant dense<0.000000e+00> : vector<128xf32>
    %31 = vector.multi_reduction <add>, %30, %cst_16 [0] : vector<16x128xf32> to vector<128xf32>
    %32 = vector.shape_cast %31 : vector<128xf32> to vector<1x128xf32>
    %c0_i32_17 = arith.constant 0 : i32
    %33 = arith.cmpi eq, %arg0, %c0_i32_17 : i32
    %34 = arith.extui %33 : i1 to i32
    %c0_i32_18 = arith.constant 0 : i32
    %35 = arith.cmpi ne, %34, %c0_i32_18 : i32
    scf.if %35 {
      %cst_23 = arith.constant 0.000000e+00 : f32
      %40 = vector.broadcast %cst_23 : f32 to vector<2x128xf32>
      %c0_24 = arith.constant 0 : index
      %c0_25 = arith.constant 0 : index
      %41 = vector.load %arg6[%c0_24, %c0_25] : memref<2x128xf32, #tpu.memory_space<vmem>>, vector<2x128xf32>
      tpu.vector_store %arg6[%c0_24, %c0_25], %40 {strides = array<i32>} : memref<2x128xf32, #tpu.memory_space<vmem>>, vector<2x128xf32>,
    } else {
    }
    %c0_19 = arith.constant 0 : index
    %c0_20 = arith.constant 0 : index
    %36 = vector.load %arg6[%c0_19, %c0_20] : memref<2x128xf32, #tpu.memory_space<vmem>>, vector<2x128xf32>
    %37 = tpu.concatenate %29, %32 in 0 : vector<1x128xf32>, vector<1x128xf32> -> vector<2x128xf32>
    %38 = arith.addf %36, %37 : vector<2x128xf32>
    %c0_21 = arith.constant 0 : index
    %c0_22 = arith.constant 0 : index
    %39 = vector.load %arg6[%c0_21, %c0_22] : memref<2x128xf32, #tpu.memory_space<vmem>>, vector<2x128xf32>
    tpu.vector_store %arg6[%c0_21, %c0_22], %38 {strides = array<i32>} : memref<2x128xf32, #tpu.memory_space<vmem>>, vector<2x128xf32>,
    return
  }
  func.func @transform_0(%arg0: i32) -> (i32, i32, i32) {
    %c0_i32 = arith.constant 0 : i32
    %c0_i32_0 = arith.constant 0 : i32
    %c0_i32_1 = arith.constant 0 : i32
    return %arg0, %c0_i32, %c0_i32_0 : i32, i32, i32
  }
  func.func @transform_1(%arg0: i32) -> (i32, i32) {
    %c0_i32 = arith.constant 0 : i32
    %c0_i32_0 = arith.constant 0 : i32
    %c0_i32_1 = arith.constant 0 : i32
    return %c0_i32, %c0_i32_0 : i32, i32
  }
  func.func @transform_2(%arg0: i32) -> (i32, i32) {
    %c0_i32 = arith.constant 0 : i32
    %c0_i32_0 = arith.constant 0 : i32
    %c0_i32_1 = arith.constant 0 : i32
    return %c0_i32, %c0_i32_0 : i32, i32
  }
  func.func @transform_3(%arg0: i32) -> (i32, i32) {
    %c0_i32 = arith.constant 0 : i32
    %c0_i32_0 = arith.constant 0 : i32
    %c0_i32_1 = arith.constant 0 : i32
    return %c0_i32, %c0_i32_0 : i32, i32
  }
  func.func @transform_4(%arg0: i32) -> (i32, i32, i32) {
    %c0_i32 = arith.constant 0 : i32
    %c0_i32_0 = arith.constant 0 : i32
    %c0_i32_1 = arith.constant 0 : i32
    return %arg0, %c0_i32, %c0_i32_0 : i32, i32, i32
  }
  func.func @transform_5(%arg0: i32) -> (i32, i32) {
    %c0_i32 = arith.constant 0 : i32
    %c0_i32_0 = arith.constant 0 : i32
    %c0_i32_1 = arith.constant 0 : i32
    return %c0_i32, %c0_i32_0 : i32, i32
  }
}

module attributes {stable_mosaic.version = 11 : i64} {
  func.func @_conv1_stats_kernel(%arg0: i32, %arg1: memref<1x16x128xf32, #tpu.memory_space<vmem>>, %arg2: memref<384x128xbf16, #tpu.memory_space<vmem>>, %arg3: memref<1x16x128xf32, #tpu.memory_space<vmem>>, %arg4: memref<2x128xf32, #tpu.memory_space<vmem>>) attributes {dimension_semantics = [#tpu.dimension_semantics<arbitrary>], iteration_bounds = array<i64: 2>, scalar_prefetch = 0 : i64, scratch_operands = 0 : i64, tpu.core_type = #tpu.core_type<tc>, window_params = [{transform_indices = @transform_0, window_bounds = array<i64: 1, 16, 128>}, {pipeline_mode = #tpu.pipeline_mode<synchronous>, transform_indices = @transform_1, window_bounds = array<i64: 384, 128>}, {transform_indices = @transform_2, window_bounds = array<i64: 1, 16, 128>}, {pipeline_mode = #tpu.pipeline_mode<synchronous>, transform_indices = @transform_3, window_bounds = array<i64: 2, 128>}]} {
    %c0 = arith.constant 0 : index
    %c0_0 = arith.constant 0 : index
    %c0_1 = arith.constant 0 : index
    %0 = vector.load %arg1[%c0, %c0_0, %c0_1] : memref<1x16x128xf32, #tpu.memory_space<vmem>>, vector<1x16x128xf32>
    %1 = vector.shape_cast %0 : vector<1x16x128xf32> to vector<16x128xf32>
    %2 = tpu.iota {dimensions = array<i32: 0>} : vector<16x128xi32>
    %c0_i32 = arith.constant 0 : i32
    %3 = vector.broadcast %c0_i32 : i32 to vector<16x128xi32>
    %4 = arith.cmpi eq, %2, %3 : vector<16x128xi32>
    %c1_i32 = arith.constant 1 : i32
    %5 = tpu.dynamic_rotate %1 by %c1_i32 dim 0 : vector<16x128xf32>, i32 -> vector<16x128xf32>
    %cst = arith.constant 0.000000e+00 : f32
    %6 = vector.broadcast %cst : f32 to vector<16x128xf32>
    %7 = arith.select %4, %6, %5 : vector<16x128xi1>, vector<16x128xf32>
    %c15_i32 = arith.constant 15 : i32
    %8 = vector.broadcast %c15_i32 : i32 to vector<16x128xi32>
    %9 = arith.cmpi eq, %2, %8 : vector<16x128xi32>
    %c15_i32_2 = arith.constant 15 : i32
    %10 = tpu.dynamic_rotate %1 by %c15_i32_2 dim 0 : vector<16x128xf32>, i32 -> vector<16x128xf32>
    %cst_3 = arith.constant 0.000000e+00 : f32
    %11 = vector.broadcast %cst_3 : f32 to vector<16x128xf32>
    %12 = arith.select %9, %11, %10 : vector<16x128xi1>, vector<16x128xf32>
    %13 = tpu.concatenate %7, %1, %12 in 1 : vector<16x128xf32>, vector<16x128xf32>, vector<16x128xf32> -> vector<16x384xf32>
    %14 = arith.truncf %13 : vector<16x384xf32> to vector<16x384xbf16>
    %c0_4 = arith.constant 0 : index
    %c0_5 = arith.constant 0 : index
    %15 = vector.load %arg2[%c0_4, %c0_5] : memref<384x128xbf16, #tpu.memory_space<vmem>>, vector<384x128xbf16>
    %cst_6 = arith.constant dense<0.000000e+00> : vector<16x128xf32>
    %16 = tpu.matmul %14, %15, %cst_6 {dimension_numbers = #tpu.dot_dimension_numbers<[1], [0], [0], [1], [0, 0, 1, 1], [], []>} : vector<16x384xbf16>, vector<384x128xbf16>, vector<16x128xf32> -> vector<16x128xf32>
    %c0_7 = arith.constant 0 : index
    %c0_8 = arith.constant 0 : index
    %c0_9 = arith.constant 0 : index
    %17 = vector.load %arg3[%c0_7, %c0_8, %c0_9] : memref<1x16x128xf32, #tpu.memory_space<vmem>>, vector<1x16x128xf32>
    %18 = vector.shape_cast %17 : vector<1x16x128xf32> to vector<16x128xf32>
    %19 = vector.shape_cast %16 : vector<16x128xf32> to vector<1x16x128xf32>
    tpu.vector_store %arg3[%c0_7, %c0_8, %c0_9], %19 {strides = array<i32>} : memref<1x16x128xf32, #tpu.memory_space<vmem>>, vector<1x16x128xf32>,
    %cst_10 = arith.constant dense<0.000000e+00> : vector<128xf32>
    %20 = vector.multi_reduction <add>, %16, %cst_10 [0] : vector<16x128xf32> to vector<128xf32>
    %21 = vector.shape_cast %20 : vector<128xf32> to vector<1x128xf32>
    %22 = arith.mulf %16, %16 : vector<16x128xf32>
    %cst_11 = arith.constant dense<0.000000e+00> : vector<128xf32>
    %23 = vector.multi_reduction <add>, %22, %cst_11 [0] : vector<16x128xf32> to vector<128xf32>
    %24 = vector.shape_cast %23 : vector<128xf32> to vector<1x128xf32>
    %c0_i32_12 = arith.constant 0 : i32
    %25 = arith.cmpi eq, %arg0, %c0_i32_12 : i32
    %26 = arith.extui %25 : i1 to i32
    %c0_i32_13 = arith.constant 0 : i32
    %27 = arith.cmpi ne, %26, %c0_i32_13 : i32
    scf.if %27 {
      %cst_18 = arith.constant 0.000000e+00 : f32
      %32 = vector.broadcast %cst_18 : f32 to vector<2x128xf32>
      %c0_19 = arith.constant 0 : index
      %c0_20 = arith.constant 0 : index
      %33 = vector.load %arg4[%c0_19, %c0_20] : memref<2x128xf32, #tpu.memory_space<vmem>>, vector<2x128xf32>
      tpu.vector_store %arg4[%c0_19, %c0_20], %32 {strides = array<i32>} : memref<2x128xf32, #tpu.memory_space<vmem>>, vector<2x128xf32>,
    } else {
    }
    %c0_14 = arith.constant 0 : index
    %c0_15 = arith.constant 0 : index
    %28 = vector.load %arg4[%c0_14, %c0_15] : memref<2x128xf32, #tpu.memory_space<vmem>>, vector<2x128xf32>
    %29 = tpu.concatenate %21, %24 in 0 : vector<1x128xf32>, vector<1x128xf32> -> vector<2x128xf32>
    %30 = arith.addf %28, %29 : vector<2x128xf32>
    %c0_16 = arith.constant 0 : index
    %c0_17 = arith.constant 0 : index
    %31 = vector.load %arg4[%c0_16, %c0_17] : memref<2x128xf32, #tpu.memory_space<vmem>>, vector<2x128xf32>
    tpu.vector_store %arg4[%c0_16, %c0_17], %30 {strides = array<i32>} : memref<2x128xf32, #tpu.memory_space<vmem>>, vector<2x128xf32>,
    return
  }
  func.func @transform_0(%arg0: i32) -> (i32, i32, i32) {
    %c0_i32 = arith.constant 0 : i32
    %c0_i32_0 = arith.constant 0 : i32
    %c0_i32_1 = arith.constant 0 : i32
    return %arg0, %c0_i32, %c0_i32_0 : i32, i32, i32
  }
  func.func @transform_1(%arg0: i32) -> (i32, i32) {
    %c0_i32 = arith.constant 0 : i32
    %c0_i32_0 = arith.constant 0 : i32
    %c0_i32_1 = arith.constant 0 : i32
    return %c0_i32, %c0_i32_0 : i32, i32
  }
  func.func @transform_2(%arg0: i32) -> (i32, i32, i32) {
    %c0_i32 = arith.constant 0 : i32
    %c0_i32_0 = arith.constant 0 : i32
    %c0_i32_1 = arith.constant 0 : i32
    return %arg0, %c0_i32, %c0_i32_0 : i32, i32, i32
  }
  func.func @transform_3(%arg0: i32) -> (i32, i32) {
    %c0_i32 = arith.constant 0 : i32
    %c0_i32_0 = arith.constant 0 : i32
    %c0_i32_1 = arith.constant 0 : i32
    return %c0_i32, %c0_i32_0 : i32, i32
  }
}

module attributes {stable_mosaic.version = 11 : i64} {
  func.func @_bn_add_relu_kernel(%arg0: i32, %arg1: memref<1x16x128xf32, #tpu.memory_space<vmem>>, %arg2: memref<1x128xf32, #tpu.memory_space<vmem>>, %arg3: memref<1x128xf32, #tpu.memory_space<vmem>>, %arg4: memref<1x16x128xf32, #tpu.memory_space<vmem>>, %arg5: memref<1x16x128xf32, #tpu.memory_space<vmem>>) attributes {dimension_semantics = [#tpu.dimension_semantics<parallel>], iteration_bounds = array<i64: 2>, scalar_prefetch = 0 : i64, scratch_operands = 0 : i64, tpu.core_type = #tpu.core_type<tc>, window_params = [{transform_indices = @transform_0, window_bounds = array<i64: 1, 16, 128>}, {pipeline_mode = #tpu.pipeline_mode<synchronous>, transform_indices = @transform_1, window_bounds = array<i64: 1, 128>}, {pipeline_mode = #tpu.pipeline_mode<synchronous>, transform_indices = @transform_2, window_bounds = array<i64: 1, 128>}, {transform_indices = @transform_3, window_bounds = array<i64: 1, 16, 128>}, {transform_indices = @transform_4, window_bounds = array<i64: 1, 16, 128>}]} {
    %c0 = arith.constant 0 : index
    %c0_0 = arith.constant 0 : index
    %c0_1 = arith.constant 0 : index
    %0 = vector.load %arg1[%c0, %c0_0, %c0_1] : memref<1x16x128xf32, #tpu.memory_space<vmem>>, vector<1x16x128xf32>
    %1 = vector.shape_cast %0 : vector<1x16x128xf32> to vector<16x128xf32>
    %c0_2 = arith.constant 0 : index
    %c0_3 = arith.constant 0 : index
    %2 = vector.load %arg2[%c0_2, %c0_3] : memref<1x128xf32, #tpu.memory_space<vmem>>, vector<1x128xf32>
    %3 = vector.broadcast %2 : vector<1x128xf32> to vector<16x128xf32>
    %4 = arith.mulf %1, %3 : vector<16x128xf32>
    %c0_4 = arith.constant 0 : index
    %c0_5 = arith.constant 0 : index
    %5 = vector.load %arg3[%c0_4, %c0_5] : memref<1x128xf32, #tpu.memory_space<vmem>>, vector<1x128xf32>
    %6 = vector.broadcast %5 : vector<1x128xf32> to vector<16x128xf32>
    %7 = arith.addf %4, %6 : vector<16x128xf32>
    %c0_6 = arith.constant 0 : index
    %c0_7 = arith.constant 0 : index
    %c0_8 = arith.constant 0 : index
    %8 = vector.load %arg4[%c0_6, %c0_7, %c0_8] : memref<1x16x128xf32, #tpu.memory_space<vmem>>, vector<1x16x128xf32>
    %9 = vector.shape_cast %8 : vector<1x16x128xf32> to vector<16x128xf32>
    %10 = arith.addf %7, %9 : vector<16x128xf32>
    %cst = arith.constant 0.000000e+00 : f32
    %11 = vector.broadcast %cst : f32 to vector<16x128xf32>
    %12 = arith.maximumf %10, %11 : vector<16x128xf32>
    %c0_9 = arith.constant 0 : index
    %c0_10 = arith.constant 0 : index
    %c0_11 = arith.constant 0 : index
    %13 = vector.load %arg5[%c0_9, %c0_10, %c0_11] : memref<1x16x128xf32, #tpu.memory_space<vmem>>, vector<1x16x128xf32>
    %14 = vector.shape_cast %13 : vector<1x16x128xf32> to vector<16x128xf32>
    %15 = vector.shape_cast %12 : vector<16x128xf32> to vector<1x16x128xf32>
    tpu.vector_store %arg5[%c0_9, %c0_10, %c0_11], %15 {strides = array<i32>} : memref<1x16x128xf32, #tpu.memory_space<vmem>>, vector<1x16x128xf32>,
    return
  }
  func.func @transform_0(%arg0: i32) -> (i32, i32, i32) {
    %c0_i32 = arith.constant 0 : i32
    %c0_i32_0 = arith.constant 0 : i32
    %c0_i32_1 = arith.constant 0 : i32
    return %arg0, %c0_i32, %c0_i32_0 : i32, i32, i32
  }
  func.func @transform_1(%arg0: i32) -> (i32, i32) {
    %c0_i32 = arith.constant 0 : i32
    %c0_i32_0 = arith.constant 0 : i32
    %c0_i32_1 = arith.constant 0 : i32
    return %c0_i32, %c0_i32_0 : i32, i32
  }
  func.func @transform_2(%arg0: i32) -> (i32, i32) {
    %c0_i32 = arith.constant 0 : i32
    %c0_i32_0 = arith.constant 0 : i32
    %c0_i32_1 = arith.constant 0 : i32
    return %c0_i32, %c0_i32_0 : i32, i32
  }
  func.func @transform_3(%arg0: i32) -> (i32, i32, i32) {
    %c0_i32 = arith.constant 0 : i32
    %c0_i32_0 = arith.constant 0 : i32
    %c0_i32_1 = arith.constant 0 : i32
    return %arg0, %c0_i32, %c0_i32_0 : i32, i32, i32
  }
  func.func @transform_4(%arg0: i32) -> (i32, i32, i32) {
    %c0_i32 = arith.constant 0 : i32
    %c0_i32_0 = arith.constant 0 : i32
    %c0_i32_1 = arith.constant 0 : i32
    return %arg0, %c0_i32, %c0_i32_0 : i32, i32, i32
  }
}

</mosaic_0001>

<bundles_post_ra>
// kernel: resnet18_block.5
= control target key start
LH: loop header
LB: loop body
LE: loop exit
PB: predicated region body
PF: predicated region fallthrough
CT: control target
= control target key end

     0   :  { %s372_s15 = smov 0   ;;  %s398_s0 = inlined_call_operand.vmem [shape: f32[2,16,128], index: 0, kind: input, shape index: {}]   ;;  %s399_s1 = inlined_call_operand.vmem [shape: f32[1,128], index: 1, kind: input, shape index: {}]   ;;  %s400_s2 = inlined_call_operand.vmem [shape: f32[1,128], index: 2, kind: input, shape index: {}]   ;;  %s401_s3 = inlined_call_operand.vmem [shape: f32[2,16,128], index: 3, kind: input, shape index: {}]   ;;  %s402_s4 = inlined_call_operand.vmem [shape: f32[2,16,128], index: 4, kind: output, shape index: {}]  }
   0x1 LB: > { %s313_s16 = sadd.s32 4294967295, %s345_s15   ;;  %p317_p0 = scmp.ge.s32.totalorder %s345_s15, 1  ;;  %s345_s15 = sphi %s372_s15, %s14_s15  }
   0x2   : > { %p172_p1 = scmp.lt.s32.totalorder %s345_s15, 3 }
   0x4   : > { %p173_p2 = pnand %p317_p0, %p172_p1 }
   0x5   : > { %p203_p3 = scmp.lt.s32.totalorder (!%p173_p2), %s313_s16, 1  ;;  %v324_v0 = vld [vmem:[%s399_s1] ss:$0 sm:$0xff] (!%p173_p2) }
   0x6   : > { %176 = sbr.rel (%p173_p2) target bundleno = 26 (0x1a), region = 36  ;;  %v325_v3 = vld [vmem:[%s400_s2] ss:$0 sm:$0xff] (!%p173_p2) }
   0xd   : > { %s404_s16 = smov (!%p203_p3, %s313_s16), 1 }
   0xe   : > { %s328_s17 = sshll.u32 %s404_s16, 4 }
   0xf   : > { %s207_s22 = scalar_lea.vmem %s398_s0, %s328_s17  ;;  %s212_s25 = scalar_lea.vmem %s401_s3, %s328_s17 }
  0x10   : > { %v218_v1 = vld [vmem:[%s207_s22] sm:$0xff]  ;;  %v219_v2 = vld [vmem:[%s207_s22 + $0x8] sm:$0xff]  ;;  %s217_s30 = scalar_lea.vmem %s402_s4, %s328_s17 }
  0x11   : > { %v227_v4 = vmul.f32 %v324_v0, %v218_v1  ;;  %v228_v5 = vmul.f32 %v324_v0, %v219_v2  ;;  %v238_v6 = vld [vmem:[%s212_s25] sm:$0xff]  ;;  %v239_v7 = vld [vmem:[%s212_s25 + $0x8] sm:$0xff] }
  0x13   : > { %v236_v8 = vadd.f32 %v325_v3, %v227_v4  ;;  %v237_v9 = vadd.f32 %v325_v3, %v228_v5 }
  0x15   : > { %v240_v10 = vadd.f32 %v238_v6, %v236_v8  ;;  %v241_v11 = vadd.f32 %v239_v7, %v237_v9 }
  0x17   : > { %v242_v12 = vmax.f32 %v240_v10, 0.0  ;;  %v243_v13 = vmax.f32 %v241_v11, 0.0 }
  0x19   : > { %244 = vst [vmem:[%s217_s30] sm:$0xff] %v242_v12  ;;  %245 = vst [vmem:[%s217_s30 + $0x8] sm:$0xff] %v243_v13 }
  0x1a PF: > { %s14_s15 = sadd.s32 1, %s345_s15  }
  0x1b   : > { %p11_p4 = scmp.ge.s32.totalorder %s14_s15, 4  }
  0x1d   :  { %13 = sbr.rel (!%p11_p4) target bundleno = 1 (0x1), region = 69 }

// kernel: resnet18_block.3
= control target key start
LH: loop header
LB: loop body
LE: loop exit
PB: predicated region body
PF: predicated region fallthrough
CT: control target
= control target key end

     0   :  { %s726_s12 = smov 0   ;;  %s847_s0 = inlined_call_operand.vmem [shape: f32[2,16,128], index: 0, kind: input, shape index: {}]   ;;  %s848_s1 = inlined_call_operand.vmem [shape: bf16[384,128], index: 1, kind: input, shape index: {}]   ;;  %s849_s2 = inlined_call_operand.vmem [shape: f32[2,16,128], index: 2, kind: output, shape index: {0}]   ;;  %s850_s3 = inlined_call_operand.vmem [shape: f32[2,128], index: 3, kind: output, shape index: {1}]  }
   0x1 LB: > { %s732_s13 = sadd.s32 4294967295, %s700_s12   ;;  %p563_p0 = scmp.ge.s32.totalorder %s700_s12, 1  ;;  %s700_s12 = sphi %s726_s12, %s14_s12  }
   0x2   : > { %p135_p1 = scmp.lt.s32.totalorder %s700_s12, 3 }
   0x4   : > { %p136_p2 = pnand %p563_p0, %p135_p1 }
   0x5   : > { %v670_v0 = vld [vmem:[%s848_s1 + $0x40] sm:$0xff] (!%p136_p2)   ;;  %v702_v1 = vmov (!%p136_p2), 0.0   ;;  %v673_v4 = vld [vmem:[%s848_s1 + $0x48] sm:$0xff] (!%p136_p2)   ;;  %vm703_vm0 = vmmov (!%p136_p2), 0   ;;  %v676_v7 = vld [vmem:[%s848_s1 + $0x50] sm:$0xff] (!%p136_p2)   ;;  %p159_p3 = scmp.lt.s32.totalorder (!%p136_p2), %s732_s13, 1  ;;  %v172_v17 = vlaneseq (!%p136_p2) }
   0x6   : > { %139 = sbr.rel (%p136_p2) target bundleno = 277 (0x115), region = 28  ;;  %638 = vmatprep.subr.bf16.mxu1 (!%p136_p2), %v702_v1  ;;  %v671_v2 = vld [vmem:[%s848_s1] sm:$0xff] (!%p136_p2)   ;;  %607 = vmatprep.subr.bf16.mxu0 (!%p136_p2), %v670_v0  ;;  %v674_v5 = vld [vmem:[%s848_s1 + $0x8] sm:$0xff] (!%p136_p2)   ;;  %v677_v8 = vld [vmem:[%s848_s1 + $0x10] sm:$0xff] (!%p136_p2)   ;;  %vm704_vm5 = vmmov (!%p136_p2), 1   ;;  %p600_p4 = scmp.ne.s32.totalorder (!%p136_p2), %s732_s13, 0 }
   0x7   : > { %v672_v3 = vld [vmem:[%s848_s1 + $0x80] sm:$0xff] (!%p136_p2)   ;;  %608 = vmatpush3.bf16.msra.mxu0 (!%p136_p2), %v671_v2  ;;  %654 = vmatprep.mubr.msk.bf16.mxu1 (!%p136_p2), %vm703_vm0, %v702_v1  ;;  %v675_v6 = vld [vmem:[%s848_s1 + $0x88] sm:$0xff] (!%p136_p2)   ;;  %v678_v9 = vld [vmem:[%s848_s1 + $0x90] sm:$0xff] (!%p136_p2)   ;;  %v173_v21 = vshrl.u32 (!%p136_p2), %v172_v17, 7 }
   0x8   : > { %639 = vmatpush3.bf16.msra.mxu1 (!%p136_p2), %v672_v3  ;;  %609 = vmatprep.subr.bf16.mxu0 (!%p136_p2), %v673_v4  ;;  %v679_v10 = vld [vmem:[%s848_s1 + $0x58] sm:$0xff] (!%p136_p2)   ;;  %v682_v13 = vld [vmem:[%s848_s1 + $0x60] sm:$0xff] (!%p136_p2)   ;;  %v685_v16 = vld [vmem:[%s848_s1 + $0x68] sm:$0xff] (!%p136_p2)  }
   0x9   : > { %640 = vmatprep.subr.bf16.mxu1 (!%p136_p2), %v702_v1  ;;  %v680_v11 = vld [vmem:[%s848_s1 + $0x18] sm:$0xff] (!%p136_p2)   ;;  %v683_v14 = vld [vmem:[%s848_s1 + $0x20] sm:$0xff] (!%p136_p2)   ;;  %v686_v18 = vld [vmem:[%s848_s1 + $0x28] sm:$0xff] (!%p136_p2)   ;;  %vm179_vm1 = vcmp.lt.s32.totalorder (!%p136_p2), %v173_v21, 1  ;;  %v174_v27 = vadd.s32 (!%p136_p2), 8, %v173_v21  ;;  %vm188_vm2 = vcmp.lt.s32.totalorder (!%p136_p2), %v173_v21, 7 }
   0xa   : > { %v681_v12 = vld [vmem:[%s848_s1 + $0x98] sm:$0xff] (!%p136_p2)   ;;  %v684_v15 = vld [vmem:[%s848_s1 + $0xa0] sm:$0xff] (!%p136_p2)   ;;  %v687_v19 = vld [vmem:[%s848_s1 + $0xa8] sm:$0xff] (!%p136_p2)   ;;  %vm605_vm3 = vcmp.ne.s32.totalorder (!%p136_p2), %v173_v21, 0 }
   0xb   : > { %610 = vmatpush3.bf16.msra.mxu0 (!%p136_p2), %v674_v5  ;;  %v688_v20 = vld [vmem:[%s848_s1 + $0x70] sm:$0xff] (!%p136_p2)   ;;  %v691_v24 = vld [vmem:[%s848_s1 + $0x78] sm:$0xff] (!%p136_p2)   ;;  %vm606_vm4 = vcmp.ne.s32.totalorder (!%p136_p2), %v174_v27, 15  ;;  %vm593_vm6 = vmpackc.low (!%p136_p2), %vm704_vm5, %vm605_vm3 }
   0xc   : > { %641 = vmatpush3.bf16.msra.mxu1 (!%p136_p2), %v675_v6  ;;  %611 = vmatprep.subr.bf16.mxu0 (!%p136_p2), %v676_v7  ;;  %v689_v22 = vld [vmem:[%s848_s1 + $0x30] sm:$0xff] (!%p136_p2)   ;;  %v692_v33 = vld [vmem:[%s848_s1 + $0x38] sm:$0xff] (!%p136_p2)   ;;  %vm597_vm7 = vmpackc.low (!%p136_p2), %vm606_vm4, %vm704_vm5 }
   0xd   : > { %642 = vmatprep.subr.bf16.mxu1 %v702_v1  ;;  %s785_s17 = scalar_select %p159_p3, %s732_s13, 1  ;;  %v690_v23 = vld [vmem:[%s848_s1 + $0xb0] sm:$0xff]   ;;  %v693_v36 = vld [vmem:[%s848_s1 + $0xb8] sm:$0xff]  }
   0xe   : > { %v705_v5 = vmov (!%p600_p4), 0.0  }
   0xf   : > { %612 = vmatpush3.bf16.msra.mxu0 %v677_v8  ;;  %s603_s24 = sshll.u32 %s785_s17, 4  ;;  %492 = vst [vmem:[%s850_s3] sm:$0x3] (!%p600_p4), %v705_v5 }
  0x10   : > { %643 = vmatpush3.bf16.msra.mxu1 %v678_v9  ;;  %613 = vmatprep.subr.bf16.mxu0 %v679_v10  ;;  %s163_s4 = scalar_lea.vmem %s847_s0, %s603_s24  ;;  %s168_s20 = scalar_lea.vmem %s849_s2, %s603_s24 }
  0x11   : > { %644 = vmatprep.subr.bf16.mxu1 %v702_v1  ;;  %v170_v25 = vld [vmem:[%s163_s4] sm:$0xff]  ;;  %v171_v26 = vld [vmem:[%s163_s4 + $0x8] sm:$0xff] }
  0x12   : > { %v177_v28 = vrot.slane %v170_v25, 7  ;;  %v178_v29 = vrot.slane %v171_v26, 7  ;;  %v186_v30 = vrot.slane %v170_v25, 1  ;;  %v187_v31 = vrot.slane %v171_v26, 1 }
  0x13   : > { %614 = vmatpush3.bf16.msra.mxu0 %v680_v11  ;;  %v194_v32 = vpack.c.bf16 %v171_v26, %v170_v25 }
  0x14   : > { %645 = vmatpush3.bf16.msra.mxu1 %v681_v12  ;;  %615 = vmatprep.subr.bf16.mxu0 %v682_v13  ;;  %v180_v34 = vsel %vm179_vm1, %v177_v28, %v178_v29  ;;  %v181_v35 = vsel %vm179_vm1, %v178_v29, %v177_v28  ;;  %v189_v37 = vsel %vm188_vm2, %v186_v30, %v187_v31 }
  0x15   : > { %646 = vmatprep.subr.bf16.mxu1 %v702_v1  ;;  %v190_v38 = vsel %vm188_vm2, %v187_v31, %v186_v30  ;;  %420 = vmatprep.mubr.bf16.mxu0 %v194_v32  ;;  %v594_v39 = vpack.c.bf16 %v180_v34, %v181_v35 }
  0x16   : > { %v598_v40 = vpack.c.bf16 %v190_v38, %v189_v37 }
  0x17   : > { %616 = vmatpush3.bf16.msra.mxu0 %v683_v14 }
  0x18   : > { %647 = vmatpush3.bf16.msra.mxu1 %v684_v15  ;;  %617 = vmatprep.subr.bf16.mxu0 %v685_v16 }
  0x19   : > { %648 = vmatprep.subr.bf16.mxu1 %v702_v1 }
  0x1b   : > { %618 = vmatpush3.bf16.msra.mxu0 %v686_v18 }
  0x1c   : > { %649 = vmatpush3.bf16.msra.mxu1 %v687_v19  ;;  %619 = vmatprep.subr.bf16.mxu0 %v688_v20 }
  0x1d   : > { %650 = vmatprep.subr.bf16.mxu1 %v702_v1 }
  0x1f   : > { %620 = vmatpush3.bf16.msra.mxu0 %v689_v22 }
  0x20   : > { %651 = vmatpush3.bf16.msra.mxu1 %v690_v23  ;;  %621 = vmatprep.subr.bf16.mxu0 %v691_v24 }
  0x21   : > { %652 = vmatprep.subr.bf16.mxu1 %v702_v1 }
  0x23   : > { %622 = vmatpush3.bf16.msra.mxu0 %v692_v33 }
  0x24   : > { %653 = vmatpush3.bf16.msra.mxu1 %v693_v36 }
  0x26   : > { %595 = vmatmul.mubr.msk.bf16.vlgmr.msra.gmra.mrb[0].mxu0 %vm593_vm6, %v594_v39 }
  0x27   : > { %655 = vmatmul.mubr.msk.bf16.vlgmr.msra.gmra.mrb[0].mxu1 %vm597_vm7, %v598_v40 }
  0xf9   : > { %v623_v41 = vpop.f32.mrb[0].mxu0 }
  0xfa   : > { %v463_v42 = vpop.f32.mrb[0].mxu1  ;;  %v624_v43 = vpop.f32.mrb[1].mxu0 }
  0xfb   : > { %v625_v44 = vadd.f32 %v624_v43, %v623_v41  ;;  %v656_v45 = vpop.f32.mrb[1].mxu1  ;;  %v626_v46 = vpop.f32.mrb[2].mxu0 }
  0xfc   : > { %v466_v47 = vpop.f32.mrb[2].mxu1  ;;  %v627_v48 = vpop.f32.mrb[3].mxu0 }
  0xfd   : > { %v464_v49 = vadd.f32 %v625_v44, %v463_v42  ;;  %v628_v50 = vadd.f32 %v627_v48, %v626_v46  ;;  %v657_v51 = vpop.f32.mrb[3].mxu1 }
  0xff   : > { %470 = vst [vmem:[%s168_s20] sm:$0xff] %v464_v49  ;;  %v467_v52 = vadd.f32 %v628_v50, %v466_v47  ;;  %v479_v53 = vmul.f32 %v464_v49, %v464_v49 }
 0x101   : > { %471 = vst [vmem:[%s168_s20 + $0x8] sm:$0xff] %v467_v52  ;;  %v472_v54 = vadd.f32 %v467_v52, %v464_v49  ;;  %v480_v55 = vmul.f32 %v467_v52, %v467_v52 }
 0x103   : > { %v473_v56 = vrot.slane %v472_v54, 4  ;;  %v481_v57 = vadd.f32 %v480_v55, %v479_v53 }
 0x105   : > { %v474_v58 = vadd.f32 %v473_v56, %v472_v54  ;;  %v482_v59 = vrot.slane %v481_v57, 4 }
 0x107   : > { %v475_v60 = vrot.slane %v474_v58, 2  ;;  %v483_v61 = vadd.f32 %v482_v59, %v481_v57 }
 0x109   : > { %v476_v62 = vadd.f32 %v475_v60, %v474_v58  ;;  %v484_v63 = vrot.slane %v483_v61, 2  ;;  %491 = sbr.rel (%p600_p4) target bundleno = 272 (0x110), region = 32 }
 0x10b   : > { %v477_v0 = vrot.slane %v476_v62, 1  ;;  %v485_v1 = vadd.f32 %v484_v63, %v483_v61 }
 0x10d   : > { %v478_v2 = vadd.f32 %v477_v0, %v476_v62  ;;  %v486_v3 = vrot.slane %v485_v1, 1 }
 0x10f   : > { %v487_v4 = vadd.f32 %v486_v3, %v485_v1 }
 0x110 PF: > { %v493_v6 = vld [vmem:[%s850_s3] sm:$0x3]  ;;  %vm494_vm8 = vcmask 1040384  }
 0x111   : > { %v495_v7 = vsel %vm494_vm8, %v478_v2, %v487_v4 }
 0x112   : > { %v496_v8 = vadd.f32 %v495_v7, %v493_v6 }
 0x114   : > { %497 = vst [vmem:[%s850_s3] sm:$0x3] %v496_v8 }
 0x115 PF: > { %s14_s12 = sadd.s32 1, %s700_s12  }
 0x116   : > { %p11_p5 = scmp.ge.s32.totalorder %s14_s12, 4  }
 0x118   :  { %13 = sbr.rel (!%p11_p5) target bundleno = 1 (0x1), region = 70 }

// kernel: resnet18_block.4
= control target key start
LH: loop header
LB: loop body
LE: loop exit
PB: predicated region body
PF: predicated region fallthrough
CT: control target
= control target key end

     0   :  { %s812_s18 = smov 0   ;;  %s937_s0 = inlined_call_operand.vmem [shape: f32[2,16,128], index: 0, kind: input, shape index: {}]   ;;  %s938_s1 = inlined_call_operand.vmem [shape: f32[1,128], index: 1, kind: input, shape index: {}]   ;;  %s939_s2 = inlined_call_operand.vmem [shape: f32[1,128], index: 2, kind: input, shape index: {}]   ;;  %s940_s3 = inlined_call_operand.vmem [shape: bf16[384,128], index: 3, kind: input, shape index: {}]   ;;  %s941_s4 = inlined_call_operand.vmem [shape: f32[2,16,128], index: 4, kind: output, shape index: {0}]   ;;  %s942_s5 = inlined_call_operand.vmem [shape: f32[2,128], index: 5, kind: output, shape index: {1}]  }
   0x1 LB: > { %s818_s19 = sadd.s32 4294967295, %s776_s18   ;;  %p637_p0 = scmp.ge.s32.totalorder %s776_s18, 1  ;;  %s776_s18 = sphi %s812_s18, %s16_s18  }
   0x2   : > { %p185_p1 = scmp.lt.s32.totalorder %s776_s18, 3 }
   0x4   : > { %p186_p2 = pnand %p637_p0, %p185_p1 }
   0x5   : > { %v746_v0 = vld [vmem:[%s940_s3 + $0x40] sm:$0xff] (!%p186_p2)   ;;  %v778_v1 = vmov (!%p186_p2), 0.0   ;;  %v749_v4 = vld [vmem:[%s940_s3 + $0x48] sm:$0xff] (!%p186_p2)   ;;  %vm779_vm0 = vmmov (!%p186_p2), 0   ;;  %v752_v7 = vld [vmem:[%s940_s3 + $0x50] sm:$0xff] (!%p186_p2)   ;;  %p213_p3 = scmp.lt.s32.totalorder (!%p186_p2), %s818_s19, 1  ;;  %v246_v18 = vlaneseq (!%p186_p2) }
   0x6   : > { %189 = sbr.rel (%p186_p2) target bundleno = 277 (0x115), region = 36  ;;  %714 = vmatprep.subr.bf16.mxu1 (!%p186_p2), %v778_v1  ;;  %v747_v2 = vld [vmem:[%s940_s3] sm:$0xff] (!%p186_p2)   ;;  %683 = vmatprep.subr.bf16.mxu0 (!%p186_p2), %v746_v0  ;;  %v750_v5 = vld [vmem:[%s940_s3 + $0x8] sm:$0xff] (!%p186_p2)   ;;  %v753_v8 = vld [vmem:[%s940_s3 + $0x10] sm:$0xff] (!%p186_p2)   ;;  %vm780_vm5 = vmmov (!%p186_p2), 1   ;;  %p676_p4 = scmp.ne.s32.totalorder (!%p186_p2), %s818_s19, 0 }
   0x7   : > { %v748_v3 = vld [vmem:[%s940_s3 + $0x80] sm:$0xff] (!%p186_p2)   ;;  %684 = vmatpush3.bf16.msra.mxu0 (!%p186_p2), %v747_v2  ;;  %730 = vmatprep.mubr.msk.bf16.mxu1 (!%p186_p2), %vm779_vm0, %v778_v1  ;;  %v751_v6 = vld [vmem:[%s940_s3 + $0x88] sm:$0xff] (!%p186_p2)   ;;  %v754_v9 = vld [vmem:[%s940_s3 + $0x90] sm:$0xff] (!%p186_p2)   ;;  %v247_v23 = vshrl.u32 (!%p186_p2), %v246_v18, 7 }
   0x8   : > { %715 = vmatpush3.bf16.msra.mxu1 (!%p186_p2), %v748_v3  ;;  %685 = vmatprep.subr.bf16.mxu0 (!%p186_p2), %v749_v4  ;;  %v755_v10 = vld [vmem:[%s940_s3 + $0x58] sm:$0xff] (!%p186_p2)   ;;  %v758_v13 = vld [vmem:[%s940_s3 + $0x60] sm:$0xff] (!%p186_p2)   ;;  %v761_v16 = vld [vmem:[%s940_s3 + $0x68] sm:$0xff] (!%p186_p2)  }
   0x9   : > { %716 = vmatprep.subr.bf16.mxu1 (!%p186_p2), %v778_v1  ;;  %v756_v11 = vld [vmem:[%s940_s3 + $0x18] sm:$0xff] (!%p186_p2)   ;;  %v759_v14 = vld [vmem:[%s940_s3 + $0x20] sm:$0xff] (!%p186_p2)   ;;  %v762_v17 = vld [vmem:[%s940_s3 + $0x28] sm:$0xff] (!%p186_p2)   ;;  %v248_v31 = vadd.s32 (!%p186_p2), 8, %v247_v23  ;;  %vm681_vm1 = vcmp.ne.s32.totalorder (!%p186_p2), %v247_v23, 0  ;;  %vm253_vm2 = vcmp.lt.s32.totalorder (!%p186_p2), %v247_v23, 1 }
   0xa   : > { %v757_v12 = vld [vmem:[%s940_s3 + $0x98] sm:$0xff] (!%p186_p2)   ;;  %v760_v15 = vld [vmem:[%s940_s3 + $0xa0] sm:$0xff] (!%p186_p2)   ;;  %v763_v19 = vld [vmem:[%s940_s3 + $0xa8] sm:$0xff] (!%p186_p2)   ;;  %vm262_vm3 = vcmp.lt.s32.totalorder (!%p186_p2), %v247_v23, 7 }
   0xb   : > { %686 = vmatpush3.bf16.msra.mxu0 (!%p186_p2), %v750_v5  ;;  %v764_v20 = vld [vmem:[%s940_s3 + $0x70] sm:$0xff] (!%p186_p2)   ;;  %v767_v24 = vld [vmem:[%s940_s3 + $0x78] sm:$0xff] (!%p186_p2)   ;;  %v642_v27 = vld [vmem:[%s938_s1] ss:$0 sm:$0xff] (!%p186_p2)  ;;  %vm682_vm4 = vcmp.ne.s32.totalorder (!%p186_p2), %v248_v31, 15 }
   0xc   : > { %717 = vmatpush3.bf16.msra.mxu1 (!%p186_p2), %v751_v6  ;;  %687 = vmatprep.subr.bf16.mxu0 (!%p186_p2), %v752_v7  ;;  %v765_v21 = vld [vmem:[%s940_s3 + $0x30] sm:$0xff] (!%p186_p2)   ;;  %v643_v30 = vld [vmem:[%s939_s2] ss:$0 sm:$0xff] (!%p186_p2)  ;;  %v768_v32 = vld [vmem:[%s940_s3 + $0x38] sm:$0xff] (!%p186_p2)  }
   0xd   : > { %718 = vmatprep.subr.bf16.mxu1 %v778_v1  ;;  %s871_s25 = scalar_select %p213_p3, %s818_s19, 1  ;;  %v766_v22 = vld [vmem:[%s940_s3 + $0xb0] sm:$0xff]   ;;  %v769_v35 = vld [vmem:[%s940_s3 + $0xb8] sm:$0xff]   ;;  %vm669_vm6 = vmpackc.low %vm780_vm5, %vm681_vm1 }
   0xe   : > { %vm673_vm7 = vmpackc.low %vm682_vm4, %vm780_vm5 }
   0xf   : > { %688 = vmatpush3.bf16.msra.mxu0 %v753_v8  ;;  %s679_s7 = sshll.u32 %s871_s25, 4 }
  0x10   : > { %719 = vmatpush3.bf16.msra.mxu1 %v754_v9  ;;  %689 = vmatprep.subr.bf16.mxu0 %v755_v10  ;;  %s217_s16 = scalar_lea.vmem %s937_s0, %s679_s7  ;;  %s222_s10 = scalar_lea.vmem %s941_s4, %s679_s7 }
  0x11   : > { %720 = vmatprep.subr.bf16.mxu1 %v778_v1  ;;  %v224_v25 = vld [vmem:[%s217_s16] sm:$0xff]  ;;  %v225_v26 = vld [vmem:[%s217_s16 + $0x8] sm:$0xff] }
  0x12   : > { %v233_v28 = vmul.f32 %v642_v27, %v224_v25  ;;  %v234_v29 = vmul.f32 %v642_v27, %v225_v26 }
  0x13   : > { %690 = vmatpush3.bf16.msra.mxu0 %v756_v11 }
  0x14   : > { %721 = vmatpush3.bf16.msra.mxu1 %v757_v12  ;;  %691 = vmatprep.subr.bf16.mxu0 %v758_v13  ;;  %v242_v33 = vadd.f32 %v643_v30, %v233_v28  ;;  %v243_v34 = vadd.f32 %v643_v30, %v234_v29  ;;  %v781_v13 = vmov (!%p676_p4), 0.0  }
  0x15   : > { %722 = vmatprep.subr.bf16.mxu1 %v778_v1  ;;  %566 = vst [vmem:[%s942_s5] sm:$0x3] (!%p676_p4), %v781_v13 }
  0x16   : > { %v244_v36 = vmax.f32 %v242_v33, 0.0  ;;  %v245_v37 = vmax.f32 %v243_v34, 0.0 }
  0x17   : > { %692 = vmatpush3.bf16.msra.mxu0 %v759_v14 }
  0x18   : > { %723 = vmatpush3.bf16.msra.mxu1 %v760_v15  ;;  %693 = vmatprep.subr.bf16.mxu0 %v761_v16  ;;  %v251_v38 = vrot.slane %v244_v36, 7  ;;  %v252_v39 = vrot.slane %v245_v37, 7  ;;  %v260_v40 = vrot.slane %v244_v36, 1  ;;  %v261_v41 = vrot.slane %v245_v37, 1 }
  0x19   : > { %724 = vmatprep.subr.bf16.mxu1 %v778_v1  ;;  %v268_v42 = vpack.c.bf16 %v245_v37, %v244_v36 }
  0x1a   : > { %v254_v43 = vsel %vm253_vm2, %v251_v38, %v252_v39  ;;  %v255_v44 = vsel %vm253_vm2, %v252_v39, %v251_v38  ;;  %v263_v45 = vsel %vm262_vm3, %v260_v40, %v261_v41  ;;  %v264_v46 = vsel %vm262_vm3, %v261_v41, %v260_v40 }
  0x1b   : > { %694 = vmatpush3.bf16.msra.mxu0 %v762_v17  ;;  %494 = vmatprep.mubr.bf16.mxu0 %v268_v42  ;;  %v670_v47 = vpack.c.bf16 %v254_v43, %v255_v44  ;;  %v674_v48 = vpack.c.bf16 %v264_v46, %v263_v45 }
  0x1c   : > { %725 = vmatpush3.bf16.msra.mxu1 %v763_v19  ;;  %695 = vmatprep.subr.bf16.mxu0 %v764_v20 }
  0x1d   : > { %726 = vmatprep.subr.bf16.mxu1 %v778_v1 }
  0x1f   : > { %696 = vmatpush3.bf16.msra.mxu0 %v765_v21 }
  0x20   : > { %727 = vmatpush3.bf16.msra.mxu1 %v766_v22  ;;  %697 = vmatprep.subr.bf16.mxu0 %v767_v24 }
  0x21   : > { %728 = vmatprep.subr.bf16.mxu1 %v778_v1 }
  0x23   : > { %698 = vmatpush3.bf16.msra.mxu0 %v768_v32 }
  0x24   : > { %729 = vmatpush3.bf16.msra.mxu1 %v769_v35 }
  0x26   : > { %671 = vmatmul.mubr.msk.bf16.vlgmr.msra.gmra.mrb[0].mxu0 %vm669_vm6, %v670_v47 }
  0x27   : > { %731 = vmatmul.mubr.msk.bf16.vlgmr.msra.gmra.mrb[0].mxu1 %vm673_vm7, %v674_v48 }
  0xf9   : > { %v699_v49 = vpop.f32.mrb[0].mxu0 }
  0xfa   : > { %v537_v50 = vpop.f32.mrb[0].mxu1  ;;  %v700_v51 = vpop.f32.mrb[1].mxu0 }
  0xfb   : > { %v732_v52 = vpop.f32.mrb[1].mxu1  ;;  %v701_v53 = vadd.f32 %v700_v51, %v699_v49  ;;  %v702_v54 = vpop.f32.mrb[2].mxu0 }
  0xfc   : > { %v540_v55 = vpop.f32.mrb[2].mxu1  ;;  %v703_v56 = vpop.f32.mrb[3].mxu0 }
  0xfd   : > { %v733_v57 = vpop.f32.mrb[3].mxu1  ;;  %v538_v58 = vadd.f32 %v701_v53, %v537_v50  ;;  %v704_v59 = vadd.f32 %v703_v56, %v702_v54 }
  0xff   : > { %544 = vst [vmem:[%s222_s10] sm:$0xff] %v538_v58  ;;  %v541_v60 = vadd.f32 %v704_v59, %v540_v55  ;;  %v553_v61 = vmul.f32 %v538_v58, %v538_v58 }
 0x101   : > { %545 = vst [vmem:[%s222_s10 + $0x8] sm:$0xff] %v541_v60  ;;  %v546_v62 = vadd.f32 %v541_v60, %v538_v58  ;;  %v554_v63 = vmul.f32 %v541_v60, %v541_v60 }
 0x103   : > { %v547_v0 = vrot.slane %v546_v62, 4  ;;  %v555_v1 = vadd.f32 %v554_v63, %v553_v61 }
 0x105   : > { %v548_v2 = vadd.f32 %v547_v0, %v546_v62  ;;  %v556_v3 = vrot.slane %v555_v1, 4 }
 0x107   : > { %v549_v4 = vrot.slane %v548_v2, 2  ;;  %v557_v5 = vadd.f32 %v556_v3, %v555_v1 }
 0x109   : > { %v550_v6 = vadd.f32 %v549_v4, %v548_v2  ;;  %v558_v7 = vrot.slane %v557_v5, 2  ;;  %565 = sbr.rel (%p676_p4) target bundleno = 272 (0x110), region = 40 }
 0x10b   : > { %v551_v8 = vrot.slane %v550_v6, 1  ;;  %v559_v9 = vadd.f32 %v558_v7, %v557_v5 }
 0x10d   : > { %v552_v10 = vadd.f32 %v551_v8, %v550_v6  ;;  %v560_v11 = vrot.slane %v559_v9, 1 }
 0x10f   : > { %v561_v12 = vadd.f32 %v560_v11, %v559_v9 }
 0x110 PF: > { %v567_v14 = vld [vmem:[%s942_s5] sm:$0x3]  ;;  %vm568_vm8 = vcmask 1040384  }
 0x111   : > { %v569_v15 = vsel %vm568_vm8, %v552_v10, %v561_v12 }
 0x112   : > { %v570_v16 = vadd.f32 %v569_v15, %v567_v14 }
 0x114   : > { %571 = vst [vmem:[%s942_s5] sm:$0x3] %v570_v16 }
 0x115 PF: > { %s16_s18 = sadd.s32 1, %s776_s18  }
 0x116   : > { %p13_p5 = scmp.ge.s32.totalorder %s16_s18, 4  }
 0x118   :  { %15 = sbr.rel (!%p13_p5) target bundleno = 1 (0x1), region = 78 }

</bundles_post_ra>
